<compile_context>
chip_gen: v7x
topology: tpu7x:2x2x1
jax: 0.10.0
libtpu: 0.0.40
codegen_flags: <defaults>
</compile_context>

<pallas_src>
import functools

import jax
import jax.numpy as jnp
from jax.experimental import pallas as pl
from jax.experimental.pallas import tpu as pltpu


def _pairwise_bilinear_kernel(bias_ref, x1_ref, w_ref, x2t_ref, out_ref, *, to_block, d2):
    """One grid step: output-channel block ob (outer grid axis), batch n (inner).

    Shapes seen by the kernel:
      bias_ref : (O_pad,)         f32, SMEM (whole array resident)
      x1_ref   : (1, L1, D1)      compute dtype
      w_ref    : (1, D1, TO*D2)   compute dtype  -- W_eff[:, ob*TO:(ob+1)*TO, :] flattened
      x2t_ref  : (1, D2, L2)      compute dtype  -- input2[n] pre-transposed
      out_ref  : (1, TO, L1, L2)  output dtype
    """
    ob = pl.program_id(0)
    x1 = x1_ref[0]                       # (L1, D1)
    w = w_ref[0]                         # (D1, TO*D2)
    x2t = x2t_ref[0]                     # (D2, L2)

    # Stage 1: one fused MXU matmul covering all TO channels of this block.
    tmp = jnp.dot(x1, w, preferred_element_type=jnp.float32)        # (L1, TO*D2) f32
    tmp = tmp.astype(x2t.dtype)

    # Stage 2: contract each channel's (L1, D2) slab against x2^T (D2, L2).
    # Unrolled at trace time (to_block is a small static constant); the RHS x2t tile is
    # identical for every t, so only the LHS changes between the TO matmuls.
    for t in range(to_block):
        lhs = tmp[:, t * d2:(t + 1) * d2]                            # (L1, D2), static slice
        res = jnp.dot(lhs, x2t, preferred_element_type=jnp.float32)  # (L1, L2) f32
        res = res + bias_ref[ob * to_block + t]                      # bias add in f32
        out_ref[0, t] = res.astype(out_ref.dtype)


def _choose_to_block(O, L1, L2, D1, D2, compute_bytes, out_bytes, vmem_block_budget):
    """Largest channel block TO (capped at 64 for trace-time unroll) whose
    double-buffered tiles fit the VMEM budget (safe on v5e/v6e/v7x defaults)."""
    def step_bytes(to):
        w_blk = 2 * D1 * to * D2 * compute_bytes     # double-buffered weight tile
        x1_blk = 2 * L1 * D1 * compute_bytes
        x2_blk = 2 * D2 * L2 * compute_bytes
        o_blk = 2 * to * L1 * L2 * out_bytes
        tmp = L1 * to * D2 * 4                       # f32 stage-1 intermediate
        return w_blk + x1_blk + x2_blk + o_blk + tmp

    to = max(1, min(O, 64))
    while to > 1 and step_bytes(to) > vmem_block_budget:
        to = max(1, to // 2)
    return to


def pairwise_bilinear(input1, input2, weight, bias=None, *,
                      to_block=None,
                      compute_dtype=jnp.bfloat16,
                      vmem_limit_bytes=None,
                      vmem_block_budget=12 * 1024 * 1024):
    """PairwiseBilinear forward: (N,L1,D1) x (N,L2,D2) -> (N,L1,L2,O)."""
    N, L1, D1 = input1.shape
    N2, L2, D2 = input2.shape
    assert N == N2, (input1.shape, input2.shape)
    assert weight.shape[0] == D1 and weight.shape[1] == D2, weight.shape
    O = weight.shape[-1]

    out_dtype = input1.dtype
    cdtype = jnp.dtype(compute_dtype) if compute_dtype is not None else jnp.dtype(input1.dtype)

    if to_block is None:
        to_block = _choose_to_block(O, L1, L2, D1, D2,
                                    cdtype.itemsize, jnp.dtype(out_dtype).itemsize,
                                    vmem_block_budget)
    to_block = max(1, min(int(to_block), O))
    num_ob = -(-O // to_block)
    O_pad = num_ob * to_block

    # --- One-time (trace-level) layout plumbing on the small / batch-invariant operands.
    # Exact reproduction of the PyTorch .view() reinterpretation of the weight:
    w_eff = jnp.reshape(weight, (D1, O, D2))                         # W_eff[d1, o, c]
    bias_arr = jnp.zeros((O,), jnp.float32) if bias is None else jnp.asarray(bias, jnp.float32)
    if O_pad != O:
        w_eff = jnp.pad(w_eff, ((0, 0), (0, O_pad - O), (0, 0)))
        bias_arr = jnp.pad(bias_arr, (0, O_pad - O))
    # (num_ob, D1, TO*D2): the per-block weight tile the kernel consumes directly.
    w_blk = jnp.transpose(jnp.reshape(w_eff, (D1, num_ob, to_block, D2)), (1, 0, 2, 3))
    w_blk = jnp.reshape(w_blk, (num_ob, D1, to_block * D2)).astype(cdtype)
    # Pre-transpose input2 once so the kernel's second matmul needs no XLU transpose.
    x2t = jnp.transpose(input2, (0, 2, 1)).astype(cdtype)            # (N, D2, L2)
    x1 = input1.astype(cdtype)

    kernel = functools.partial(_pairwise_bilinear_kernel, to_block=to_block, d2=D2)

    cp_kwargs = dict(dimension_semantics=("parallel", "parallel"))
    if vmem_limit_bytes is not None:
        # v5e/v6e: up to ~64-100 MiB is safe (128 MiB physical); v7x: stay <= ~48 MiB.
        cp_kwargs["vmem_limit_bytes"] = int(vmem_limit_bytes)

    out_raw = pl.pallas_call(
        kernel,
        out_shape=jax.ShapeDtypeStruct((N, O_pad, L1, L2), out_dtype),
        grid=(num_ob, N),       # n innermost -> weight tile resident across the batch loop
        in_specs=[
            pl.BlockSpec(memory_space=pltpu.MemorySpace.SMEM),               # bias (O_pad,)
            pl.BlockSpec((1, L1, D1), lambda ob, n: (n, 0, 0)),              # input1[n]
            pl.BlockSpec((1, D1, to_block * D2), lambda ob, n: (ob, 0, 0)),  # weight block (n-invariant)
            pl.BlockSpec((1, D2, L2), lambda ob, n: (n, 0, 0)),              # input2[n]^T
        ],
        out_specs=pl.BlockSpec((1, to_block, L1, L2), lambda ob, n: (n, ob, 0, 0)),
        compiler_params=pltpu.CompilerParams(**cp_kwargs),
    )(bias_arr, x1, w_blk, x2t)

    if O_pad != O:
        out_raw = out_raw[:, :O]
    # NOTE: very long sequences would additionally want an L1 grid axis (tile L1) to
    # bound the output/intermediate tiles per step; not needed at these sizes.
    # TODO(synk): emit (N, L1, L2, O) directly from the kernel (needs a per-step
    # minor-dim transpose of the (L1, TO, L2) tile) or fuse this permute into the
    # consumer; kept here it mirrors the PyTorch epilogue transpose(2, 3).
    return jnp.transpose(out_raw, (0, 2, 3, 1))


def _reference(input1, input2, weight, bias):
    """Pure-JAX transcription of the PyTorch forward (view/bmm/transpose)."""
    N, L1, D1 = input1.shape
    _, L2, D2 = input2.shape
    O = weight.shape[-1]
    intermediate = jnp.matmul(
        input1.reshape(-1, D1), weight.reshape(-1, D2 * O)
    )                                                            # (N*L1, D2*O)
    x2_t = jnp.transpose(input2, (0, 2, 1))                      # (N, D2, L2)
    out = jnp.matmul(intermediate.reshape(N, L1 * O, D2), x2_t)  # (N, L1*O, L2)
    out = out.reshape(N, L1, O, L2).transpose(0, 1, 3, 2)        # (N, L1, L2, O)
    return out + bias


if __name__ == "__main__":
    # Small deterministic example consistent with the module's forward.
    N, L1, L2, D1, D2, O = 2, 8, 8, 32, 32, 16
    key = jax.random.PRNGKey(0)
    k1, k2, k3, k4 = jax.random.split(key, 4)

    input1 = jax.random.normal(k1, (N, L1, D1), dtype=jnp.float32)
    input2 = jax.random.normal(k2, (N, L2, D2), dtype=jnp.float32)
    # The nn.Module inits weight/bias to zeros; use deterministic non-trivial values
    # here so the kernel computation is actually exercised.
    weight = jax.random.normal(k3, (D1, D2, O), dtype=jnp.float32) * 0.05
    bias = jax.random.normal(k4, (O,), dtype=jnp.float32) * 0.1

    ref = _reference(input1, input2, weight, bias)

    # 1) f32 compute path: tight check of the exact module semantics.
    out_f32 = jax.block_until_ready(
        pairwise_bilinear(input1, input2, weight, bias, compute_dtype=jnp.float32))
    assert out_f32.shape == (N, L1, L2, O), out_f32.shape
    assert jnp.allclose(out_f32, ref, atol=2e-3, rtol=2e-3), \
        float(jnp.max(jnp.abs(out_f32 - ref)))

    # 2) Default bf16 compute path (MXU-native): same math with bf16 input/intermediate
    #    rounding; f32 accumulation and bias add inside the kernel.
    out_bf16 = jax.block_until_ready(pairwise_bilinear(input1, input2, weight, bias))
    assert out_bf16.shape == (N, L1, L2, O), out_bf16.shape
    assert jnp.allclose(out_bf16, ref, atol=2.5e-1, rtol=5e-2), \
        float(jnp.max(jnp.abs(out_bf16 - ref)))

    print("KERNEL_OK")
</pallas_src>

<mosaic_0001>
module attributes {stable_mosaic.version = 11 : i64} {
  func.func @_pairwise_bilinear_kernel(%arg0: i32, %arg1: i32, %arg2: memref<16xf32, #tpu.memory_space<smem>>, %arg3: memref<1x8x32xf32, #tpu.memory_space<vmem>>, %arg4: memref<1x32x512xf32, #tpu.memory_space<vmem>>, %arg5: memref<1x32x8xf32, #tpu.memory_space<vmem>>, %arg6: memref<1x16x8x8xf32, #tpu.memory_space<vmem>>) attributes {dimension_semantics = [#tpu.dimension_semantics<parallel>, #tpu.dimension_semantics<parallel>], iteration_bounds = array<i64: 1, 2>, scalar_prefetch = 0 : i64, scratch_operands = 0 : i64, tpu.core_type = #tpu.core_type<tc>, window_params = [{transform_indices = @transform_0, window_bounds = array<i64: 16>}, {transform_indices = @transform_1, window_bounds = array<i64: 1, 8, 32>}, {transform_indices = @transform_2, window_bounds = array<i64: 1, 32, 512>}, {transform_indices = @transform_3, window_bounds = array<i64: 1, 32, 8>}, {transform_indices = @transform_4, window_bounds = array<i64: 1, 16, 8, 8>}]} {
    %c0 = arith.constant 0 : index
    %c0_0 = arith.constant 0 : index
    %c0_1 = arith.constant 0 : index
    %0 = vector.load %arg3[%c0, %c0_0, %c0_1] : memref<1x8x32xf32, #tpu.memory_space<vmem>>, vector<1x8x32xf32>
    %1 = vector.shape_cast %0 : vector<1x8x32xf32> to vector<8x32xf32>
    %c0_2 = arith.constant 0 : index
    %c0_3 = arith.constant 0 : index
    %c0_4 = arith.constant 0 : index
    %2 = vector.load %arg4[%c0_2, %c0_3, %c0_4] : memref<1x32x512xf32, #tpu.memory_space<vmem>>, vector<1x32x512xf32>
    %3 = vector.shape_cast %2 : vector<1x32x512xf32> to vector<32x512xf32>
    %c0_5 = arith.constant 0 : index
    %c0_6 = arith.constant 0 : index
    %c0_7 = arith.constant 0 : index
    %4 = vector.load %arg5[%c0_5, %c0_6, %c0_7] : memref<1x32x8xf32, #tpu.memory_space<vmem>>, vector<1x32x8xf32>
    %5 = vector.shape_cast %4 : vector<1x32x8xf32> to vector<32x8xf32>
    %cst = arith.constant dense<0.000000e+00> : vector<8x512xf32>
    %6 = tpu.matmul %1, %3, %cst {dimension_numbers = #tpu.dot_dimension_numbers<[1], [0], [0], [1], [0, 0, 1, 1], [], []>} : vector<8x32xf32>, vector<32x512xf32>, vector<8x512xf32> -> vector<8x512xf32>
    %7 = vector.extract_strided_slice %6 {offsets = [0, 0], sizes = [8, 32], strides = [1, 1]} : vector<8x512xf32> to vector<8x32xf32>
    %cst_8 = arith.constant dense<0.000000e+00> : vector<8x8xf32>
    %8 = tpu.matmul %7, %5, %cst_8 {dimension_numbers = #tpu.dot_dimension_numbers<[1], [0], [0], [1], [0, 0, 1, 1], [], []>} : vector<8x32xf32>, vector<32x8xf32>, vector<8x8xf32> -> vector<8x8xf32>
    %c16_i32 = arith.constant 16 : i32
    %9 = arith.muli %arg0, %c16_i32 : i32
    %c0_i32 = arith.constant 0 : i32
    %10 = arith.addi %9, %c0_i32 : i32
    %11 = arith.index_cast %10 : i32 to index
    %12 = memref.load %arg2[%11] : memref<16xf32, #tpu.memory_space<smem>>
    %13 = vector.broadcast %12 : f32 to vector<8x8xf32>
    %14 = arith.addf %8, %13 : vector<8x8xf32>
    %c0_9 = arith.constant 0 : index
    %c0_10 = arith.constant 0 : index
    %c0_11 = arith.constant 0 : index
    %c0_12 = arith.constant 0 : index
    %15 = vector.load %arg6[%c0_9, %c0_10, %c0_11, %c0_12] : memref<1x16x8x8xf32, #tpu.memory_space<vmem>>, vector<1x1x8x8xf32>
    %16 = vector.shape_cast %15 : vector<1x1x8x8xf32> to vector<8x8xf32>
    %17 = vector.shape_cast %14 : vector<8x8xf32> to vector<1x1x8x8xf32>
    tpu.vector_store %arg6[%c0_9, %c0_10, %c0_11, %c0_12], %17 {strides = array<i32>} : memref<1x16x8x8xf32, #tpu.memory_space<vmem>>, vector<1x1x8x8xf32>,
    %18 = vector.extract_strided_slice %6 {offsets = [0, 32], sizes = [8, 32], strides = [1, 1]} : vector<8x512xf32> to vector<8x32xf32>
    %cst_13 = arith.constant dense<0.000000e+00> : vector<8x8xf32>
    %19 = tpu.matmul %18, %5, %cst_13 {dimension_numbers = #tpu.dot_dimension_numbers<[1], [0], [0], [1], [0, 0, 1, 1], [], []>} : vector<8x32xf32>, vector<32x8xf32>, vector<8x8xf32> -> vector<8x8xf32>
    %c16_i32_14 = arith.constant 16 : i32
    %20 = arith.muli %arg0, %c16_i32_14 : i32
    %c1_i32 = arith.constant 1 : i32
    %21 = arith.addi %20, %c1_i32 : i32
    %22 = arith.index_cast %21 : i32 to index
    %23 = memref.load %arg2[%22] : memref<16xf32, #tpu.memory_space<smem>>
    %24 = vector.broadcast %23 : f32 to vector<8x8xf32>
    %25 = arith.addf %19, %24 : vector<8x8xf32>
    %c0_15 = arith.constant 0 : index
    %c1 = arith.constant 1 : index
    %c0_16 = arith.constant 0 : index
    %c0_17 = arith.constant 0 : index
    %26 = vector.load %arg6[%c0_15, %c1, %c0_16, %c0_17] : memref<1x16x8x8xf32, #tpu.memory_space<vmem>>, vector<1x1x8x8xf32>
    %27 = vector.shape_cast %26 : vector<1x1x8x8xf32> to vector<8x8xf32>
    %28 = vector.shape_cast %25 : vector<8x8xf32> to vector<1x1x8x8xf32>
    tpu.vector_store %arg6[%c0_15, %c1, %c0_16, %c0_17], %28 {strides = array<i32>} : memref<1x16x8x8xf32, #tpu.memory_space<vmem>>, vector<1x1x8x8xf32>,
    %29 = vector.extract_strided_slice %6 {offsets = [0, 64], sizes = [8, 32], strides = [1, 1]} : vector<8x512xf32> to vector<8x32xf32>
    %cst_18 = arith.constant dense<0.000000e+00> : vector<8x8xf32>
    %30 = tpu.matmul %29, %5, %cst_18 {dimension_numbers = #tpu.dot_dimension_numbers<[1], [0], [0], [1], [0, 0, 1, 1], [], []>} : vector<8x32xf32>, vector<32x8xf32>, vector<8x8xf32> -> vector<8x8xf32>
    %c16_i32_19 = arith.constant 16 : i32
    %31 = arith.muli %arg0, %c16_i32_19 : i32
    %c2_i32 = arith.constant 2 : i32
    %32 = arith.addi %31, %c2_i32 : i32
    %33 = arith.index_cast %32 : i32 to index
    %34 = memref.load %arg2[%33] : memref<16xf32, #tpu.memory_space<smem>>
    %35 = vector.broadcast %34 : f32 to vector<8x8xf32>
    %36 = arith.addf %30, %35 : vector<8x8xf32>
    %c0_20 = arith.constant 0 : index
    %c2 = arith.constant 2 : index
    %c0_21 = arith.constant 0 : index
    %c0_22 = arith.constant 0 : index
    %37 = vector.load %arg6[%c0_20, %c2, %c0_21, %c0_22] : memref<1x16x8x8xf32, #tpu.memory_space<vmem>>, vector<1x1x8x8xf32>
    %38 = vector.shape_cast %37 : vector<1x1x8x8xf32> to vector<8x8xf32>
    %39 = vector.shape_cast %36 : vector<8x8xf32> to vector<1x1x8x8xf32>
    tpu.vector_store %arg6[%c0_20, %c2, %c0_21, %c0_22], %39 {strides = array<i32>} : memref<1x16x8x8xf32, #tpu.memory_space<vmem>>, vector<1x1x8x8xf32>,
    %40 = vector.extract_strided_slice %6 {offsets = [0, 96], sizes = [8, 32], strides = [1, 1]} : vector<8x512xf32> to vector<8x32xf32>
    %cst_23 = arith.constant dense<0.000000e+00> : vector<8x8xf32>
    %41 = tpu.matmul %40, %5, %cst_23 {dimension_numbers = #tpu.dot_dimension_numbers<[1], [0], [0], [1], [0, 0, 1, 1], [], []>} : vector<8x32xf32>, vector<32x8xf32>, vector<8x8xf32> -> vector<8x8xf32>
    %c16_i32_24 = arith.constant 16 : i32
    %42 = arith.muli %arg0, %c16_i32_24 : i32
    %c3_i32 = arith.constant 3 : i32
    %43 = arith.addi %42, %c3_i32 : i32
    %44 = arith.index_cast %43 : i32 to index
    %45 = memref.load %arg2[%44] : memref<16xf32, #tpu.memory_space<smem>>
    %46 = vector.broadcast %45 : f32 to vector<8x8xf32>
    %47 = arith.addf %41, %46 : vector<8x8xf32>
    %c0_25 = arith.constant 0 : index
    %c3 = arith.constant 3 : index
    %c0_26 = arith.constant 0 : index
    %c0_27 = arith.constant 0 : index
    %48 = vector.load %arg6[%c0_25, %c3, %c0_26, %c0_27] : memref<1x16x8x8xf32, #tpu.memory_space<vmem>>, vector<1x1x8x8xf32>
    %49 = vector.shape_cast %48 : vector<1x1x8x8xf32> to vector<8x8xf32>
    %50 = vector.shape_cast %47 : vector<8x8xf32> to vector<1x1x8x8xf32>
    tpu.vector_store %arg6[%c0_25, %c3, %c0_26, %c0_27], %50 {strides = array<i32>} : memref<1x16x8x8xf32, #tpu.memory_space<vmem>>, vector<1x1x8x8xf32>,
    %51 = vector.extract_strided_slice %6 {offsets = [0, 128], sizes = [8, 32], strides = [1, 1]} : vector<8x512xf32> to vector<8x32xf32>
    %cst_28 = arith.constant dense<0.000000e+00> : vector<8x8xf32>
    %52 = tpu.matmul %51, %5, %cst_28 {dimension_numbers = #tpu.dot_dimension_numbers<[1], [0], [0], [1], [0, 0, 1, 1], [], []>} : vector<8x32xf32>, vector<32x8xf32>, vector<8x8xf32> -> vector<8x8xf32>
    %c16_i32_29 = arith.constant 16 : i32
    %53 = arith.muli %arg0, %c16_i32_29 : i32
    %c4_i32 = arith.constant 4 : i32
    %54 = arith.addi %53, %c4_i32 : i32
    %55 = arith.index_cast %54 : i32 to index
    %56 = memref.load %arg2[%55] : memref<16xf32, #tpu.memory_space<smem>>
    %57 = vector.broadcast %56 : f32 to vector<8x8xf32>
    %58 = arith.addf %52, %57 : vector<8x8xf32>
    %c0_30 = arith.constant 0 : index
    %c4 = arith.constant 4 : index
    %c0_31 = arith.constant 0 : index
    %c0_32 = arith.constant 0 : index
    %59 = vector.load %arg6[%c0_30, %c4, %c0_31, %c0_32] : memref<1x16x8x8xf32, #tpu.memory_space<vmem>>, vector<1x1x8x8xf32>
    %60 = vector.shape_cast %59 : vector<1x1x8x8xf32> to vector<8x8xf32>
    %61 = vector.shape_cast %58 : vector<8x8xf32> to vector<1x1x8x8xf32>
    tpu.vector_store %arg6[%c0_30, %c4, %c0_31, %c0_32], %61 {strides = array<i32>} : memref<1x16x8x8xf32, #tpu.memory_space<vmem>>, vector<1x1x8x8xf32>,
    %62 = vector.extract_strided_slice %6 {offsets = [0, 160], sizes = [8, 32], strides = [1, 1]} : vector<8x512xf32> to vector<8x32xf32>
    %cst_33 = arith.constant dense<0.000000e+00> : vector<8x8xf32>
    %63 = tpu.matmul %62, %5, %cst_33 {dimension_numbers = #tpu.dot_dimension_numbers<[1], [0], [0], [1], [0, 0, 1, 1], [], []>} : vector<8x32xf32>, vector<32x8xf32>, vector<8x8xf32> -> vector<8x8xf32>
    %c16_i32_34 = arith.constant 16 : i32
    %64 = arith.muli %arg0, %c16_i32_34 : i32
    %c5_i32 = arith.constant 5 : i32
    %65 = arith.addi %64, %c5_i32 : i32
    %66 = arith.index_cast %65 : i32 to index
    %67 = memref.load %arg2[%66] : memref<16xf32, #tpu.memory_space<smem>>
    %68 = vector.broadcast %67 : f32 to vector<8x8xf32>
    %69 = arith.addf %63, %68 : vector<8x8xf32>
    %c0_35 = arith.constant 0 : index
    %c5 = arith.constant 5 : index
    %c0_36 = arith.constant 0 : index
    %c0_37 = arith.constant 0 : index
    %70 = vector.load %arg6[%c0_35, %c5, %c0_36, %c0_37] : memref<1x16x8x8xf32, #tpu.memory_space<vmem>>, vector<1x1x8x8xf32>
    %71 = vector.shape_cast %70 : vector<1x1x8x8xf32> to vector<8x8xf32>
    %72 = vector.shape_cast %69 : vector<8x8xf32> to vector<1x1x8x8xf32>
    tpu.vector_store %arg6[%c0_35, %c5, %c0_36, %c0_37], %72 {strides = array<i32>} : memref<1x16x8x8xf32, #tpu.memory_space<vmem>>, vector<1x1x8x8xf32>,
    %73 = vector.extract_strided_slice %6 {offsets = [0, 192], sizes = [8, 32], strides = [1, 1]} : vector<8x512xf32> to vector<8x32xf32>
    %cst_38 = arith.constant dense<0.000000e+00> : vector<8x8xf32>
    %74 = tpu.matmul %73, %5, %cst_38 {dimension_numbers = #tpu.dot_dimension_numbers<[1], [0], [0], [1], [0, 0, 1, 1], [], []>} : vector<8x32xf32>, vector<32x8xf32>, vector<8x8xf32> -> vector<8x8xf32>
    %c16_i32_39 = arith.constant 16 : i32
    %75 = arith.muli %arg0, %c16_i32_39 : i32
    %c6_i32 = arith.constant 6 : i32
    %76 = arith.addi %75, %c6_i32 : i32
    %77 = arith.index_cast %76 : i32 to index
    %78 = memref.load %arg2[%77] : memref<16xf32, #tpu.memory_space<smem>>
    %79 = vector.broadcast %78 : f32 to vector<8x8xf32>
    %80 = arith.addf %74, %79 : vector<8x8xf32>
    %c0_40 = arith.constant 0 : index
    %c6 = arith.constant 6 : index
    %c0_41 = arith.constant 0 : index
    %c0_42 = arith.constant 0 : index
    %81 = vector.load %arg6[%c0_40, %c6, %c0_41, %c0_42] : memref<1x16x8x8xf32, #tpu.memory_space<vmem>>, vector<1x1x8x8xf32>
    %82 = vector.shape_cast %81 : vector<1x1x8x8xf32> to vector<8x8xf32>
    %83 = vector.shape_cast %80 : vector<8x8xf32> to vector<1x1x8x8xf32>
    tpu.vector_store %arg6[%c0_40, %c6, %c0_41, %c0_42], %83 {strides = array<i32>} : memref<1x16x8x8xf32, #tpu.memory_space<vmem>>, vector<1x1x8x8xf32>,
    %84 = vector.extract_strided_slice %6 {offsets = [0, 224], sizes = [8, 32], strides = [1, 1]} : vector<8x512xf32> to vector<8x32xf32>
    %cst_43 = arith.constant dense<0.000000e+00> : vector<8x8xf32>
    %85 = tpu.matmul %84, %5, %cst_43 {dimension_numbers = #tpu.dot_dimension_numbers<[1], [0], [0], [1], [0, 0, 1, 1], [], []>} : vector<8x32xf32>, vector<32x8xf32>, vector<8x8xf32> -> vector<8x8xf32>
    %c16_i32_44 = arith.constant 16 : i32
    %86 = arith.muli %arg0, %c16_i32_44 : i32
    %c7_i32 = arith.constant 7 : i32
    %87 = arith.addi %86, %c7_i32 : i32
    %88 = arith.index_cast %87 : i32 to index
    %89 = memref.load %arg2[%88] : memref<16xf32, #tpu.memory_space<smem>>
    %90 = vector.broadcast %89 : f32 to vector<8x8xf32>
    %91 = arith.addf %85, %90 : vector<8x8xf32>
    %c0_45 = arith.constant 0 : index
    %c7 = arith.constant 7 : index
    %c0_46 = arith.constant 0 : index
    %c0_47 = arith.constant 0 : index
    %92 = vector.load %arg6[%c0_45, %c7, %c0_46, %c0_47] : memref<1x16x8x8xf32, #tpu.memory_space<vmem>>, vector<1x1x8x8xf32>
    %93 = vector.shape_cast %92 : vector<1x1x8x8xf32> to vector<8x8xf32>
    %94 = vector.shape_cast %91 : vector<8x8xf32> to vector<1x1x8x8xf32>
    tpu.vector_store %arg6[%c0_45, %c7, %c0_46, %c0_47], %94 {strides = array<i32>} : memref<1x16x8x8xf32, #tpu.memory_space<vmem>>, vector<1x1x8x8xf32>,
    %95 = vector.extract_strided_slice %6 {offsets = [0, 256], sizes = [8, 32], strides = [1, 1]} : vector<8x512xf32> to vector<8x32xf32>
    %cst_48 = arith.constant dense<0.000000e+00> : vector<8x8xf32>
    %96 = tpu.matmul %95, %5, %cst_48 {dimension_numbers = #tpu.dot_dimension_numbers<[1], [0], [0], [1], [0, 0, 1, 1], [], []>} : vector<8x32xf32>, vector<32x8xf32>, vector<8x8xf32> -> vector<8x8xf32>
    %c16_i32_49 = arith.constant 16 : i32
    %97 = arith.muli %arg0, %c16_i32_49 : i32
    %c8_i32 = arith.constant 8 : i32
    %98 = arith.addi %97, %c8_i32 : i32
    %99 = arith.index_cast %98 : i32 to index
    %100 = memref.load %arg2[%99] : memref<16xf32, #tpu.memory_space<smem>>
    %101 = vector.broadcast %100 : f32 to vector<8x8xf32>
    %102 = arith.addf %96, %101 : vector<8x8xf32>
    %c0_50 = arith.constant 0 : index
    %c8 = arith.constant 8 : index
    %c0_51 = arith.constant 0 : index
    %c0_52 = arith.constant 0 : index
    %103 = vector.load %arg6[%c0_50, %c8, %c0_51, %c0_52] : memref<1x16x8x8xf32, #tpu.memory_space<vmem>>, vector<1x1x8x8xf32>
    %104 = vector.shape_cast %103 : vector<1x1x8x8xf32> to vector<8x8xf32>
    %105 = vector.shape_cast %102 : vector<8x8xf32> to vector<1x1x8x8xf32>
    tpu.vector_store %arg6[%c0_50, %c8, %c0_51, %c0_52], %105 {strides = array<i32>} : memref<1x16x8x8xf32, #tpu.memory_space<vmem>>, vector<1x1x8x8xf32>,
    %106 = vector.extract_strided_slice %6 {offsets = [0, 288], sizes = [8, 32], strides = [1, 1]} : vector<8x512xf32> to vector<8x32xf32>
    %cst_53 = arith.constant dense<0.000000e+00> : vector<8x8xf32>
    %107 = tpu.matmul %106, %5, %cst_53 {dimension_numbers = #tpu.dot_dimension_numbers<[1], [0], [0], [1], [0, 0, 1, 1], [], []>} : vector<8x32xf32>, vector<32x8xf32>, vector<8x8xf32> -> vector<8x8xf32>
    %c16_i32_54 = arith.constant 16 : i32
    %108 = arith.muli %arg0, %c16_i32_54 : i32
    %c9_i32 = arith.constant 9 : i32
    %109 = arith.addi %108, %c9_i32 : i32
    %110 = arith.index_cast %109 : i32 to index
    %111 = memref.load %arg2[%110] : memref<16xf32, #tpu.memory_space<smem>>
    %112 = vector.broadcast %111 : f32 to vector<8x8xf32>
    %113 = arith.addf %107, %112 : vector<8x8xf32>
    %c0_55 = arith.constant 0 : index
    %c9 = arith.constant 9 : index
    %c0_56 = arith.constant 0 : index
    %c0_57 = arith.constant 0 : index
    %114 = vector.load %arg6[%c0_55, %c9, %c0_56, %c0_57] : memref<1x16x8x8xf32, #tpu.memory_space<vmem>>, vector<1x1x8x8xf32>
    %115 = vector.shape_cast %114 : vector<1x1x8x8xf32> to vector<8x8xf32>
    %116 = vector.shape_cast %113 : vector<8x8xf32> to vector<1x1x8x8xf32>
    tpu.vector_store %arg6[%c0_55, %c9, %c0_56, %c0_57], %116 {strides = array<i32>} : memref<1x16x8x8xf32, #tpu.memory_space<vmem>>, vector<1x1x8x8xf32>,
    %117 = vector.extract_strided_slice %6 {offsets = [0, 320], sizes = [8, 32], strides = [1, 1]} : vector<8x512xf32> to vector<8x32xf32>
    %cst_58 = arith.constant dense<0.000000e+00> : vector<8x8xf32>
    %118 = tpu.matmul %117, %5, %cst_58 {dimension_numbers = #tpu.dot_dimension_numbers<[1], [0], [0], [1], [0, 0, 1, 1], [], []>} : vector<8x32xf32>, vector<32x8xf32>, vector<8x8xf32> -> vector<8x8xf32>
    %c16_i32_59 = arith.constant 16 : i32
    %119 = arith.muli %arg0, %c16_i32_59 : i32
    %c10_i32 = arith.constant 10 : i32
    %120 = arith.addi %119, %c10_i32 : i32
    %121 = arith.index_cast %120 : i32 to index
    %122 = memref.load %arg2[%121] : memref<16xf32, #tpu.memory_space<smem>>
    %123 = vector.broadcast %122 : f32 to vector<8x8xf32>
    %124 = arith.addf %118, %123 : vector<8x8xf32>
    %c0_60 = arith.constant 0 : index
    %c10 = arith.constant 10 : index
    %c0_61 = arith.constant 0 : index
    %c0_62 = arith.constant 0 : index
    %125 = vector.load %arg6[%c0_60, %c10, %c0_61, %c0_62] : memref<1x16x8x8xf32, #tpu.memory_space<vmem>>, vector<1x1x8x8xf32>
    %126 = vector.shape_cast %125 : vector<1x1x8x8xf32> to vector<8x8xf32>
    %127 = vector.shape_cast %124 : vector<8x8xf32> to vector<1x1x8x8xf32>
    tpu.vector_store %arg6[%c0_60, %c10, %c0_61, %c0_62], %127 {strides = array<i32>} : memref<1x16x8x8xf32, #tpu.memory_space<vmem>>, vector<1x1x8x8xf32>,
    %128 = vector.extract_strided_slice %6 {offsets = [0, 352], sizes = [8, 32], strides = [1, 1]} : vector<8x512xf32> to vector<8x32xf32>
    %cst_63 = arith.constant dense<0.000000e+00> : vector<8x8xf32>
    %129 = tpu.matmul %128, %5, %cst_63 {dimension_numbers = #tpu.dot_dimension_numbers<[1], [0], [0], [1], [0, 0, 1, 1], [], []>} : vector<8x32xf32>, vector<32x8xf32>, vector<8x8xf32> -> vector<8x8xf32>
    %c16_i32_64 = arith.constant 16 : i32
    %130 = arith.muli %arg0, %c16_i32_64 : i32
    %c11_i32 = arith.constant 11 : i32
    %131 = arith.addi %130, %c11_i32 : i32
    %132 = arith.index_cast %131 : i32 to index
    %133 = memref.load %arg2[%132] : memref<16xf32, #tpu.memory_space<smem>>
    %134 = vector.broadcast %133 : f32 to vector<8x8xf32>
    %135 = arith.addf %129, %134 : vector<8x8xf32>
    %c0_65 = arith.constant 0 : index
    %c11 = arith.constant 11 : index
    %c0_66 = arith.constant 0 : index
    %c0_67 = arith.constant 0 : index
    %136 = vector.load %arg6[%c0_65, %c11, %c0_66, %c0_67] : memref<1x16x8x8xf32, #tpu.memory_space<vmem>>, vector<1x1x8x8xf32>
    %137 = vector.shape_cast %136 : vector<1x1x8x8xf32> to vector<8x8xf32>
    %138 = vector.shape_cast %135 : vector<8x8xf32> to vector<1x1x8x8xf32>
    tpu.vector_store %arg6[%c0_65, %c11, %c0_66, %c0_67], %138 {strides = array<i32>} : memref<1x16x8x8xf32, #tpu.memory_space<vmem>>, vector<1x1x8x8xf32>,
    %139 = vector.extract_strided_slice %6 {offsets = [0, 384], sizes = [8, 32], strides = [1, 1]} : vector<8x512xf32> to vector<8x32xf32>
    %cst_68 = arith.constant dense<0.000000e+00> : vector<8x8xf32>
    %140 = tpu.matmul %139, %5, %cst_68 {dimension_numbers = #tpu.dot_dimension_numbers<[1], [0], [0], [1], [0, 0, 1, 1], [], []>} : vector<8x32xf32>, vector<32x8xf32>, vector<8x8xf32> -> vector<8x8xf32>
    %c16_i32_69 = arith.constant 16 : i32
    %141 = arith.muli %arg0, %c16_i32_69 : i32
    %c12_i32 = arith.constant 12 : i32
    %142 = arith.addi %141, %c12_i32 : i32
    %143 = arith.index_cast %142 : i32 to index
    %144 = memref.load %arg2[%143] : memref<16xf32, #tpu.memory_space<smem>>
    %145 = vector.broadcast %144 : f32 to vector<8x8xf32>
    %146 = arith.addf %140, %145 : vector<8x8xf32>
    %c0_70 = arith.constant 0 : index
    %c12 = arith.constant 12 : index
    %c0_71 = arith.constant 0 : index
    %c0_72 = arith.constant 0 : index
    %147 = vector.load %arg6[%c0_70, %c12, %c0_71, %c0_72] : memref<1x16x8x8xf32, #tpu.memory_space<vmem>>, vector<1x1x8x8xf32>
    %148 = vector.shape_cast %147 : vector<1x1x8x8xf32> to vector<8x8xf32>
    %149 = vector.shape_cast %146 : vector<8x8xf32> to vector<1x1x8x8xf32>
    tpu.vector_store %arg6[%c0_70, %c12, %c0_71, %c0_72], %149 {strides = array<i32>} : memref<1x16x8x8xf32, #tpu.memory_space<vmem>>, vector<1x1x8x8xf32>,
    %150 = vector.extract_strided_slice %6 {offsets = [0, 416], sizes = [8, 32], strides = [1, 1]} : vector<8x512xf32> to vector<8x32xf32>
    %cst_73 = arith.constant dense<0.000000e+00> : vector<8x8xf32>
    %151 = tpu.matmul %150, %5, %cst_73 {dimension_numbers = #tpu.dot_dimension_numbers<[1], [0], [0], [1], [0, 0, 1, 1], [], []>} : vector<8x32xf32>, vector<32x8xf32>, vector<8x8xf32> -> vector<8x8xf32>
    %c16_i32_74 = arith.constant 16 : i32
    %152 = arith.muli %arg0, %c16_i32_74 : i32
    %c13_i32 = arith.constant 13 : i32
    %153 = arith.addi %152, %c13_i32 : i32
    %154 = arith.index_cast %153 : i32 to index
    %155 = memref.load %arg2[%154] : memref<16xf32, #tpu.memory_space<smem>>
    %156 = vector.broadcast %155 : f32 to vector<8x8xf32>
    %157 = arith.addf %151, %156 : vector<8x8xf32>
    %c0_75 = arith.constant 0 : index
    %c13 = arith.constant 13 : index
    %c0_76 = arith.constant 0 : index
    %c0_77 = arith.constant 0 : index
    %158 = vector.load %arg6[%c0_75, %c13, %c0_76, %c0_77] : memref<1x16x8x8xf32, #tpu.memory_space<vmem>>, vector<1x1x8x8xf32>
    %159 = vector.shape_cast %158 : vector<1x1x8x8xf32> to vector<8x8xf32>
    %160 = vector.shape_cast %157 : vector<8x8xf32> to vector<1x1x8x8xf32>
    tpu.vector_store %arg6[%c0_75, %c13, %c0_76, %c0_77], %160 {strides = array<i32>} : memref<1x16x8x8xf32, #tpu.memory_space<vmem>>, vector<1x1x8x8xf32>,
    %161 = vector.extract_strided_slice %6 {offsets = [0, 448], sizes = [8, 32], strides = [1, 1]} : vector<8x512xf32> to vector<8x32xf32>
    %cst_78 = arith.constant dense<0.000000e+00> : vector<8x8xf32>
    %162 = tpu.matmul %161, %5, %cst_78 {dimension_numbers = #tpu.dot_dimension_numbers<[1], [0], [0], [1], [0, 0, 1, 1], [], []>} : vector<8x32xf32>, vector<32x8xf32>, vector<8x8xf32> -> vector<8x8xf32>
    %c16_i32_79 = arith.constant 16 : i32
    %163 = arith.muli %arg0, %c16_i32_79 : i32
    %c14_i32 = arith.constant 14 : i32
    %164 = arith.addi %163, %c14_i32 : i32
    %165 = arith.index_cast %164 : i32 to index
    %166 = memref.load %arg2[%165] : memref<16xf32, #tpu.memory_space<smem>>
    %167 = vector.broadcast %166 : f32 to vector<8x8xf32>
    %168 = arith.addf %162, %167 : vector<8x8xf32>
    %c0_80 = arith.constant 0 : index
    %c14 = arith.constant 14 : index
    %c0_81 = arith.constant 0 : index
    %c0_82 = arith.constant 0 : index
    %169 = vector.load %arg6[%c0_80, %c14, %c0_81, %c0_82] : memref<1x16x8x8xf32, #tpu.memory_space<vmem>>, vector<1x1x8x8xf32>
    %170 = vector.shape_cast %169 : vector<1x1x8x8xf32> to vector<8x8xf32>
    %171 = vector.shape_cast %168 : vector<8x8xf32> to vector<1x1x8x8xf32>
    tpu.vector_store %arg6[%c0_80, %c14, %c0_81, %c0_82], %171 {strides = array<i32>} : memref<1x16x8x8xf32, #tpu.memory_space<vmem>>, vector<1x1x8x8xf32>,
    %172 = vector.extract_strided_slice %6 {offsets = [0, 480], sizes = [8, 32], strides = [1, 1]} : vector<8x512xf32> to vector<8x32xf32>
    %cst_83 = arith.constant dense<0.000000e+00> : vector<8x8xf32>
    %173 = tpu.matmul %172, %5, %cst_83 {dimension_numbers = #tpu.dot_dimension_numbers<[1], [0], [0], [1], [0, 0, 1, 1], [], []>} : vector<8x32xf32>, vector<32x8xf32>, vector<8x8xf32> -> vector<8x8xf32>
    %c16_i32_84 = arith.constant 16 : i32
    %174 = arith.muli %arg0, %c16_i32_84 : i32
    %c15_i32 = arith.constant 15 : i32
    %175 = arith.addi %174, %c15_i32 : i32
    %176 = arith.index_cast %175 : i32 to index
    %177 = memref.load %arg2[%176] : memref<16xf32, #tpu.memory_space<smem>>
    %178 = vector.broadcast %177 : f32 to vector<8x8xf32>
    %179 = arith.addf %173, %178 : vector<8x8xf32>
    %c0_85 = arith.constant 0 : index
    %c15 = arith.constant 15 : index
    %c0_86 = arith.constant 0 : index
    %c0_87 = arith.constant 0 : index
    %180 = vector.load %arg6[%c0_85, %c15, %c0_86, %c0_87] : memref<1x16x8x8xf32, #tpu.memory_space<vmem>>, vector<1x1x8x8xf32>
    %181 = vector.shape_cast %180 : vector<1x1x8x8xf32> to vector<8x8xf32>
    %182 = vector.shape_cast %179 : vector<8x8xf32> to vector<1x1x8x8xf32>
    tpu.vector_store %arg6[%c0_85, %c15, %c0_86, %c0_87], %182 {strides = array<i32>} : memref<1x16x8x8xf32, #tpu.memory_space<vmem>>, vector<1x1x8x8xf32>,
    return
  }
  func.func @transform_0(%arg0: i32, %arg1: i32) -> i32 {
    %c0_i32 = arith.constant 0 : i32
    %c0_i32_0 = arith.constant 0 : i32
    return %c0_i32 : i32
  }
  func.func @transform_1(%arg0: i32, %arg1: i32) -> (i32, i32, i32) {
    %c0_i32 = arith.constant 0 : i32
    %c0_i32_0 = arith.constant 0 : i32
    %c0_i32_1 = arith.constant 0 : i32
    return %arg1, %c0_i32, %c0_i32_0 : i32, i32, i32
  }
  func.func @transform_2(%arg0: i32, %arg1: i32) -> (i32, i32, i32) {
    %c0_i32 = arith.constant 0 : i32
    %c0_i32_0 = arith.constant 0 : i32
    %c0_i32_1 = arith.constant 0 : i32
    return %arg0, %c0_i32, %c0_i32_0 : i32, i32, i32
  }
  func.func @transform_3(%arg0: i32, %arg1: i32) -> (i32, i32, i32) {
    %c0_i32 = arith.constant 0 : i32
    %c0_i32_0 = arith.constant 0 : i32
    %c0_i32_1 = arith.constant 0 : i32
    return %arg1, %c0_i32, %c0_i32_0 : i32, i32, i32
  }
  func.func @transform_4(%arg0: i32, %arg1: i32) -> (i32, i32, i32, i32) {
    %c0_i32 = arith.constant 0 : i32
    %c0_i32_0 = arith.constant 0 : i32
    %c0_i32_1 = arith.constant 0 : i32
    return %arg1, %arg0, %c0_i32, %c0_i32_0 : i32, i32, i32, i32
  }
}

</mosaic_0001>

<bundles_post_ra>
// kernel: tpu_custom_call.1
= control target key start
LH: loop header
LB: loop body
LE: loop exit
PB: predicated region body
PF: predicated region fallthrough
CT: control target
= control target key end

     0   :  { %9 = vsyncpa [#allocation4], 0  ;;  %s2693_s0 = inlined_call_operand.vmem [shape: f32[16], index: 0, kind: input, shape index: {}]   ;;  %s2694_s1 = inlined_call_operand.vmem [shape: f32[2,8,32], index: 1, kind: input, shape index: {}]   ;;  %s2695_s2 = inlined_call_operand.hbm [shape: f32[1,32,512], index: 2, kind: input, shape index: {}]   ;;  %s2696_s3 = inlined_call_operand.vmem [shape: f32[2,32,8], index: 3, kind: input, shape index: {}]   ;;  %s2697_s4 = inlined_call_operand.vmem [shape: f32[2,16,8,8], index: 4, kind: output, shape index: {}]  }
   0x1   :  { %10 = vsyncpa [#allocation3], 0  ;;  %s2418_s15 = smov 0   ;;  %s2420_s16 = smov 0  }
   0x2   :  { %s2422_s17 = smov 0  }
   0x3 LB: > { %s1821_s18 = sadd.s32 4294967295, %s2381_s17   ;;  %s25_s19 = sadd.s32 1, %s2377_s16  ;;  %s2381_s17 = sphi %s2422_s17, %s16_s17   ;;  %s2377_s16 = sphi %s2420_s16, %s2702_s16   ;;  %s2373_s15 = sphi %s2418_s15, %s2701_s15  }
   0x4   : > { %p26_p0 = scmp.ge.s32.totalorder %s25_s19, 2  ;;  %p1823_p1 = scmp.ge.s32.totalorder %s2381_s17, 1 }
   0x5   : > { %p160_p2 = scmp.lt.s32.totalorder %s2381_s17, 3  ;;  %p2443_p4 = scmp.eq.s32.totalorder %s1821_s18, 0 }
   0x6   : > { %s2704_s19 = smov (%p26_p0, %s25_s19), 0  ;;  %s173_s24 = sshll.u32 %s2693_s0, 4  ;;  %s174_s24 = int_to_ptr.vmem [resolvable:$true] %s173_s24 }
   0x7   : > { %p2439_p3 = pnand %p1823_p1, %p160_p2  ;;  %s2383_s26 = smov [#allocation5]  }
   0x8   : > { %s186_s27 = sshll.u32 %s2383_s26, 4  ;;  %s2308_s28 = scalar_lea.vmem %s174_s24, 16  ;;  %s2458_s27 = int_to_ptr.vmem [resolvable:$true] %s186_s27 }
   0x9   : > { %p2263_p5 = pneg %p2439_p3  ;;  %p2309_p7 = scmp.ne.s32.totalorder %s174_s24, %s2308_s28 }
   0xa   : > { %p2316_p11 = scmp.lt.s32.totalorder %s174_s24, %s174_s24  ;;  %p2317_p12 = scmp.lt.s32.totalorder %s2308_s28, %s2308_s28 }
   0xb   : > { %p2454_p6 = pnand %p2443_p4, %p2263_p5 }
   0xc   : > { %p2318_p13 = por %p2317_p12, %p2316_p11 }
   0xd   : > { %p2310_p8 = pneg %p2454_p6 }
   0xf   : > { %p2311_p9 = pnand %p2310_p8, %p2309_p7 }
  0x11   : > { %p2312_p10 = pneg %p2311_p9 }
  0x13   : > { %p2319_p0 = pnand %p2318_p13, %p2312_p10 }
  0x15   : > { %2322 = shalt.err (!%p2319_p0)
}
  0x16   : > { %s2384_s29 = smov [#allocation2]   ;;  %s2323_s6 = scalar_lea.hbm %s2695_s2, 2048 }
  0x17   : > { %2266 = dma.vmem_to_smem (!%p2454_p6), %s174_s24, 16, %s2384_s29, [#allocation4]  }
  0x18   : > { %p2324_p1 = scmp.ne.s32.totalorder %s2695_s2, %s2323_s6  ;;  %p2330_p7 = scmp.lt.u32.totalorder %s2323_s6, %s2695_s2 }
  0x1a   : > { %p2326_p2 = pnand %p2324_p1, %p2310_p8 }
  0x1c   : > { %p2327_p5 = pneg %p2326_p2 }
  0x1e   : > { %p2332_p9 = pnand %p2330_p7, %p2327_p5 }
  0x20   : > { %2335 = shalt.err (!%p2332_p9)
}
  0x21   : > { %s2336_s11 = scalar_lea.vmem %s2458_s27, 2048  ;;  %p2344_p13 = scmp.lt.s32.totalorder %s2458_s27, %s2458_s27 }
  0x22   : > { %p2337_p10 = scmp.ne.s32.totalorder %s2458_s27, %s2336_s11  ;;  %p2345_p0 = scmp.lt.s32.totalorder %s2336_s11, %s2336_s11 }
  0x24   : > { %p2339_p11 = pnand %p2337_p10, %p2310_p8  ;;  %p2346_p1 = por %p2345_p0, %p2344_p13 }
  0x26   : > { %p2340_p12 = pneg %p2339_p11 }
  0x28   : > { %p2347_p2 = pnand %p2346_p1, %p2340_p12 }
  0x2a   : > { %2350 = shalt.err (!%p2347_p2)
}
  0x2b   : > { %s2385_s12 = smov 512   ;;  %s2386_s13 = smov 32  }
  0x2c   : > { %2269 = dma.hbm_to_vmem [thread:$0]  (!%p2454_p6), %s2695_s2, 2048, %s2458_s27, [#allocation3], %s2385_s12, %s2385_s12, %s2386_s13  }
  0x2d   : > { %217 = sbr.rel (%p2439_p3) target bundleno = 667 (0x29b), region = 36 }
  0x34   : > { %2364 = dma.done.wait (%p2443_p4), [#allocation4], 16  }
  0x35   : > { %2366 = vsyncadd (%p2443_p4), [#allocation4], 4294967280 }
  0x36   : > { %2368 = dma.done.wait (%p2443_p4), [#allocation3], 2048  }
  0x37   : > { %2370 = vsyncadd (%p2443_p4), [#allocation3], 4294965248 }
  0x38   : > { %227 = sfence }
  0x39   : > { %v277_v0 = vld [vmem:[#allocation5 + $0x8] sm:$0xff]  ;;  %v276_v2 = vld [vmem:[#allocation5] sm:$0xff]  ;;  %p256_p6 = scmp.lt.s32.totalorder %s2373_s15, 1  ;;  %v2387_v7 = vmov 0.0   ;;  %v279_v12 = vld [vmem:[#allocation5 + $0x18] sm:$0xff]  ;;  %vm296_vm0 = vcmask 261120  }
  0x3a   : > { %v281_v1 = vld [vmem:[#allocation5 + $0x28] sm:$0xff]  ;;  %v280_v4 = vld [vmem:[#allocation5 + $0x20] sm:$0xff]  ;;  %364 = vmatprep.mubr.f32.mxu0 %v2387_v7  ;;  %435 = vmatprep.mubr.f32.mxu1 %v2387_v7  ;;  %v283_v13 = vld [vmem:[#allocation5 + $0x38] sm:$0xff]  ;;  %v2388_v31 = vmov 0.0|0.0   ;;  %vm2389_vm1 = vmmov 0   ;;  %s2390_s28 = smov 32  }
  0x3b   : > { %v2143_v3 = vpack.c.bf16 %v281_v1, %v277_v0  ;;  %v285_v5 = vld [vmem:[#allocation5 + $0x48] sm:$0xff]  ;;  %v2145_v8 = vpack.c.bf16 %v280_v4, %v276_v2  ;;  %v284_v10 = vld [vmem:[#allocation5 + $0x40] sm:$0xff]  ;;  %s2706_s15 = smov (!%p256_p6, %s2373_s15), 1  ;;  %v278_v14 = vld [vmem:[#allocation5 + $0x10] sm:$0xff]  ;;  %v2151_v17 = vpack.c.bf16 %v283_v13, %v279_v12  ;;  %s2391_s29 = smov 96   ;;  %vm518_vm2 = vcmask 64512  }
  0x3c   : > { %v289_v6 = vld [vmem:[#allocation5 + $0x68] sm:$0xff]  ;;  %v288_v11 = vld [vmem:[#allocation5 + $0x60] sm:$0xff]  ;;  %v282_v15 = vld [vmem:[#allocation5 + $0x30] sm:$0xff]  ;;  %s1830_s20 = sshll.u32 %s2706_s15, 3  ;;  %s1885_s21 = sshll.u32 %s2706_s15, 5 }
  0x3d   : > { %v2147_v9 = vpack.c.bf16 %v289_v6, %v285_v5  ;;  %2144 = vmatprep.subr.bf16.mxu0 %v2143_v3  ;;  %v2149_v16 = vpack.c.bf16 %v288_v11, %v284_v10  ;;  %v2153_v18 = vpack.c.bf16 %v282_v15, %v278_v14  ;;  %v287_v19 = vld [vmem:[#allocation5 + $0x58] sm:$0xff]  ;;  %v286_v21 = vld [vmem:[#allocation5 + $0x50] sm:$0xff]  ;;  %s259_s24 = scalar_lea.vmem %s2694_s1, %s1830_s20  ;;  %s264_s27 = scalar_lea.vmem %s2696_s3, %s1885_s21  ;;  %2152 = vmatprep.subr.bf16.mxu1 %v2151_v17 }
  0x3e   : > { %2146 = vmatpush1.bf16.msra.mxu0 %v2145_v8  ;;  %v291_v20 = vld [vmem:[#allocation5 + $0x78] sm:$0xff]  ;;  %v290_v23 = vld [vmem:[#allocation5 + $0x70] sm:$0xff]  ;;  %v292_v24 = vld [vmem:[%s264_s27] sm:$0xff]  ;;  %s2392_s30 = smov 64   ;;  %s443_s5 = sld [smem:[#allocation2]] }
  0x3f   : > { %2148 = vmatprep.subr.bf16.mxu0 %v2147_v9  ;;  %v2155_v22 = vpack.c.bf16 %v291_v20, %v287_v19  ;;  %v293_v25 = vld [vmem:[%s264_s27 + $0x8] sm:$0xff]  ;;  %2154 = vmatpush1.bf16.msra.mxu1 %v2153_v18  ;;  %v2157_v26 = vpack.c.bf16 %v290_v23, %v286_v21  ;;  %v275_v27 = vld [vmem:[%s259_s24] sm:$0xff]  ;;  %v294_v29 = vld [vmem:[%s264_s27 + $0x10] sm:$0xff]  ;;  %s1886_s6 = sshll.u32 %s2706_s15, 7  ;;  %s1838_s10 = sld [smem:[#allocation2 + $0x1]] }
  0x40   : > { %v2516_v28 = vpack.c.bf16 %v293_v25, %v292_v24  ;;  %v295_v30 = vld [vmem:[%s264_s27 + $0x18] sm:$0xff]  ;;  %s2650_s9 = scalar_lea.vmem %s2697_s4, %s1886_s6  ;;  %s1841_s11 = sld [smem:[#allocation2 + $0x2]] }
  0x41   : > { %2156 = vmatprep.subr.bf16.mxu1 %v2155_v22  ;;  %v2520_v32 = vpack.c.bf16 %v295_v30, %v294_v29  ;;  %s1844_s12 = sld [smem:[#allocation2 + $0x3]]  ;;  %s1847_s15 = sld [smem:[#allocation2 + $0x4]] }
  0x42   : > { %2150 = vmatpush1.bf16.msra.mxu0 %v2149_v16  ;;  %s1850_s13 = sld [smem:[#allocation2 + $0x5]]  ;;  %s1853_s14 = sld [smem:[#allocation2 + $0x6]] }
  0x43   : > { %2159 = vmatprep.subr.bf16.mxu0 %v2388_v31  ;;  %2158 = vmatpush1.bf16.msra.mxu1 %v2157_v26  ;;  %s1856_s18 = sld [smem:[#allocation2 + $0x7]]  ;;  %s1859_s20 = sld [smem:[#allocation2 + $0x8]] }
  0x44   : > { %2165 = vmatprep.subr.bf16.mxu1 %v2388_v31  ;;  %v444_v49 = vstv %s443_s5  ;;  %s1862_s21 = sld [smem:[#allocation2 + $0x9]]  ;;  %s1865_s22 = sld [smem:[#allocation2 + $0xa]] }
  0x45   : > { %1835 = vmatmul.mubr.msk.f32.vlgmr.msra.gmra.mrb[0].mxu0 %vm296_vm0, %v275_v27  ;;  %v522_v53 = vstv %s1838_s10  ;;  %s1868_s23 = sld [smem:[#allocation2 + $0xb]]  ;;  %s1871_s24 = sld [smem:[#allocation2 + $0xc]] }
  0x46   : > { %2161 = vmatpush3.bf16.msra.mxu0 %v2516_v28  ;;  %1836 = vmatmul.mubr.msk.f32.vlgmr.msra.gmra.mrb[0].mxu1 %vm296_vm0, %v275_v27  ;;  %v601_v57 = vstv %s1841_s11  ;;  %s1874_s25 = sld [smem:[#allocation2 + $0xd]]  ;;  %s1877_s26 = sld [smem:[#allocation2 + $0xe]] }
  0x47   : > { %2162 = vmatprep.subr.bf16.mxu0 %v2388_v31  ;;  %2167 = vmatpush3.bf16.msra.mxu1 %v2516_v28  ;;  %v680_v61 = vstv %s1844_s12  ;;  %v759_v1 = vstv %s1847_s15  ;;  %s1880_s27 = sld [smem:[#allocation2 + $0xf]] }
  0x48   : > { %2168 = vmatprep.subr.bf16.mxu1 %v2388_v31  ;;  %1975 = vmatprep.mubr.msk.f32.mxu0 %vm2389_vm1, %v2387_v7  ;;  %v837_v5 = vstv %s1850_s13  ;;  %v916_v9 = vstv %s1853_s14 }
  0x49   : > { %1986 = vmatprep.mubr.msk.f32.mxu1 %vm2389_vm1, %v2387_v7  ;;  %v995_v13 = vstv %s1856_s18  ;;  %v1074_v17 = vstv %s1859_s20 }
  0x4a   : > { %2164 = vmatpush3.bf16.msra.mxu0 %v2520_v32  ;;  %v1152_v21 = vstv %s1862_s21  ;;  %v1231_v25 = vstv %s1865_s22 }
  0x4b   : > { %2171 = vmatprep.subr.bf16.mxu0 %v2388_v31  ;;  %2170 = vmatpush3.bf16.msra.mxu1 %v2520_v32  ;;  %v1310_v29 = vstv %s1868_s23 }
  0x4c   : > { %2177 = vmatprep.subr.bf16.mxu1 %v2388_v31 }
 0x118   : > { %v366_v33 = vpop.f32.mrb[0].mxu0 }
 0x119   : > { %681 = vrot.lane.b32.xlu1 %v366_v33, %s2390_s28  ;;  %523 = vrot.lane.b32.xlu0 %v366_v33, %s2391_s29  ;;  %v368_v34 = vpop.f32.mrb[1].mxu0  ;;  %v2537_v35 = vpop.f32.mrb[0].mxu1 }
 0x11a   : > { %1976 = vmatmul.mubr.msk.f32.vlgmr.msra.gmra.mrb[2].mxu0 %vm296_vm0, %v366_v33  ;;  %v2542_v36 = vpop.f32.mrb[1].mxu1 }
 0x11b   : > { %2173 = vmatpush3.bf16.msra.mxu0 %v2516_v28  ;;  %1997 = vmatprep.mubr.msk.f32.mxu0 %vm2389_vm1, %v2387_v7 }
 0x11c   : > { %2174 = vmatprep.subr.bf16.mxu0 %v2388_v31 }
 0x11d   : > { %602 = vrot.lane.b32.xlu0 %v366_v33, %s2392_s30  ;;  %838 = vrot.lane.b32.xlu1 %v368_v34, %s2391_s29  ;;  %v1389_v33 = vstv %s1871_s24 }
 0x11f   : > { %2176 = vmatpush3.bf16.msra.mxu0 %v2520_v32 }
 0x120   : > { %2183 = vmatprep.subr.bf16.mxu0 %v2388_v31 }
 0x121   : > { %917 = vrot.lane.b32.xlu0 %v368_v34, %s2392_s30  ;;  %996 = vrot.lane.b32.xlu1 %v368_v34, %s2390_s28 }
 0x125   : > { %1153 = vrot.lane.b32.xlu0 %v2537_v35, %s2391_s29  ;;  %1232 = vrot.lane.b32.xlu1 %v2537_v35, %s2392_s30 }
 0x129   : > { %1311 = vrot.lane.b32.xlu0 %v2537_v35, %s2390_s28  ;;  %1468 = vrot.lane.b32.xlu1 %v2542_v36, %s2391_s29 }
 0x12d   : > { %1547 = vrot.lane.b32.xlu0 %v2542_v36, %s2392_s30  ;;  %1626 = vrot.lane.b32.xlu1 %v2542_v36, %s2390_s28 }
 0x18b   : > { %v524_v37 = vpop.permute.xlu0 %523  ;;  %v682_v39 = vpop.permute.xlu1 %681 }
 0x18c   : > { %1987 = vmatmul.mubr.msk.f32.vlgmr.msra.gmra.mrb[2].mxu1 %vm296_vm0, %v524_v37  ;;  %v1467_v37 = vstv %s1874_s25 }
 0x18d   : > { %2179 = vmatpush3.bf16.msra.mxu1 %v2516_v28  ;;  %2008 = vmatprep.mubr.msk.f32.mxu1 %vm2389_vm1, %v2387_v7 }
 0x18e   : > { %2180 = vmatprep.subr.bf16.mxu1 %v2388_v31 }
 0x18f   : > { %v603_v38 = vpop.permute.xlu0 %602  ;;  %v839_v40 = vpop.permute.xlu1 %838 }
 0x190   : > { %1998 = vmatmul.mubr.msk.f32.vlgmr.msra.gmra.mrb[4].mxu0 %vm296_vm0, %v603_v38 }
 0x191   : > { %2182 = vmatpush3.bf16.msra.mxu1 %v2520_v32  ;;  %2185 = vmatpush3.bf16.msra.mxu0 %v2516_v28 }
 0x192   : > { %2186 = vmatprep.subr.bf16.mxu0 %v2388_v31  ;;  %2189 = vmatprep.subr.bf16.mxu1 %v2388_v31 }
 0x193   : > { %2019 = vmatprep.mubr.msk.f32.mxu0 %vm2389_vm1, %v2387_v7  ;;  %v918_v41 = vpop.permute.xlu0 %917  ;;  %v997_v42 = vpop.permute.xlu1 %996 }
 0x194   : > { %2009 = vmatmul.mubr.msk.f32.vlgmr.msra.gmra.mrb[4].mxu1 %vm296_vm0, %v682_v39 }
 0x195   : > { %2188 = vmatpush3.bf16.msra.mxu0 %v2520_v32  ;;  %2191 = vmatpush3.bf16.msra.mxu1 %v2516_v28 }
 0x196   : > { %2192 = vmatprep.subr.bf16.mxu1 %v2388_v31  ;;  %2195 = vmatprep.subr.bf16.mxu0 %v2388_v31 }
 0x197   : > { %2030 = vmatprep.mubr.msk.f32.mxu1 %vm2389_vm1, %v2387_v7  ;;  %v1154_v43 = vpop.permute.xlu0 %1153  ;;  %v1233_v44 = vpop.permute.xlu1 %1232 }
 0x198   : > { %2020 = vmatmul.mubr.msk.f32.vlgmr.msra.gmra.mrb[6].mxu0 %vm296_vm0, %v368_v34 }
 0x199   : > { %2194 = vmatpush3.bf16.msra.mxu1 %v2520_v32  ;;  %2197 = vmatpush3.bf16.msra.mxu0 %v2516_v28 }
 0x19a   : > { %2198 = vmatprep.subr.bf16.mxu0 %v2388_v31  ;;  %2201 = vmatprep.subr.bf16.mxu1 %v2388_v31 }
 0x19b   : > { %2041 = vmatprep.mubr.msk.f32.mxu0 %vm2389_vm1, %v2387_v7  ;;  %v1312_v45 = vpop.permute.xlu0 %1311  ;;  %v1469_v46 = vpop.permute.xlu1 %1468 }
 0x19c   : > { %2031 = vmatmul.mubr.msk.f32.vlgmr.msra.gmra.mrb[6].mxu1 %vm296_vm0, %v839_v40 }
 0x19d   : > { %2200 = vmatpush3.bf16.msra.mxu0 %v2520_v32  ;;  %2203 = vmatpush3.bf16.msra.mxu1 %v2516_v28 }
 0x19e   : > { %2204 = vmatprep.subr.bf16.mxu1 %v2388_v31  ;;  %2207 = vmatprep.subr.bf16.mxu0 %v2388_v31 }
 0x19f   : > { %2052 = vmatprep.mubr.msk.f32.mxu1 %vm2389_vm1, %v2387_v7  ;;  %v1548_v47 = vpop.permute.xlu0 %1547  ;;  %v1627_v48 = vpop.permute.xlu1 %1626 }
 0x1a0   : > { %2042 = vmatmul.mubr.msk.f32.vlgmr.msra.gmra.mrb[8].mxu0 %vm296_vm0, %v918_v41  ;;  %v1546_v41 = vstv %s1877_s26 }
 0x1a1   : > { %2206 = vmatpush3.bf16.msra.mxu1 %v2520_v32  ;;  %2209 = vmatpush3.bf16.msra.mxu0 %v2516_v28 }
 0x1a2   : > { %2213 = vmatprep.subr.bf16.mxu1 %v2388_v31  ;;  %2210 = vmatprep.subr.bf16.mxu0 %v2388_v31 }
 0x1a3   : > { %2063 = vmatprep.mubr.msk.f32.mxu0 %vm2389_vm1, %v2387_v7 }
 0x1a4   : > { %2053 = vmatmul.mubr.msk.f32.vlgmr.msra.gmra.mrb[8].mxu1 %vm296_vm0, %v997_v42 }
 0x1a5   : > { %2212 = vmatpush3.bf16.msra.mxu0 %v2520_v32  ;;  %2215 = vmatpush3.bf16.msra.mxu1 %v2516_v28 }
 0x1a6   : > { %2216 = vmatprep.subr.bf16.mxu1 %v2388_v31  ;;  %2219 = vmatprep.subr.bf16.mxu0 %v2388_v31 }
 0x1a7   : > { %2074 = vmatprep.mubr.msk.f32.mxu1 %vm2389_vm1, %v2387_v7 }
 0x1a8   : > { %2064 = vmatmul.mubr.msk.f32.vlgmr.msra.gmra.mrb[10].mxu0 %vm296_vm0, %v2537_v35 }
 0x1a9   : > { %2218 = vmatpush3.bf16.msra.mxu1 %v2520_v32  ;;  %2221 = vmatpush3.bf16.msra.mxu0 %v2516_v28 }
 0x1aa   : > { %2225 = vmatprep.subr.bf16.mxu1 %v2388_v31  ;;  %2222 = vmatprep.subr.bf16.mxu0 %v2388_v31 }
 0x1ab   : > { %2085 = vmatprep.mubr.msk.f32.mxu0 %vm2389_vm1, %v2387_v7 }
 0x1ac   : > { %2075 = vmatmul.mubr.msk.f32.vlgmr.msra.gmra.mrb[10].mxu1 %vm296_vm0, %v1154_v43 }
 0x1ad   : > { %2224 = vmatpush3.bf16.msra.mxu0 %v2520_v32  ;;  %2227 = vmatpush3.bf16.msra.mxu1 %v2516_v28 }
 0x1ae   : > { %2228 = vmatprep.subr.bf16.mxu1 %v2388_v31  ;;  %2231 = vmatprep.subr.bf16.mxu0 %v2388_v31 }
 0x1af   : > { %2096 = vmatprep.mubr.msk.f32.mxu1 %vm2389_vm1, %v2387_v7 }
 0x1b0   : > { %2086 = vmatmul.mubr.msk.f32.vlgmr.msra.gmra.mrb[12].mxu0 %vm296_vm0, %v1233_v44 }
 0x1b1   : > { %2230 = vmatpush3.bf16.msra.mxu1 %v2520_v32  ;;  %2233 = vmatpush3.bf16.msra.mxu0 %v2516_v28 }
 0x1b2   : > { %2234 = vmatprep.subr.bf16.mxu0 %v2388_v31  ;;  %2237 = vmatprep.subr.bf16.mxu1 %v2388_v31 }
 0x1b3   : > { %2107 = vmatprep.mubr.msk.f32.mxu0 %vm2389_vm1, %v2387_v7 }
 0x1b4   : > { %2097 = vmatmul.mubr.msk.f32.vlgmr.msra.gmra.mrb[12].mxu1 %vm296_vm0, %v1312_v45  ;;  %v1625_v45 = vstv %s1880_s27 }
 0x1b5   : > { %2236 = vmatpush3.bf16.msra.mxu0 %v2520_v32  ;;  %2239 = vmatpush3.bf16.msra.mxu1 %v2516_v28 }
 0x1b6   : > { %2240 = vmatprep.subr.bf16.mxu1 %v2388_v31  ;;  %2243 = vmatprep.subr.bf16.mxu0 %v2388_v31 }
 0x1b7   : > { %2118 = vmatprep.mubr.msk.f32.mxu1 %vm2389_vm1, %v2387_v7 }
 0x1b8   : > { %2108 = vmatmul.mubr.msk.f32.vlgmr.msra.gmra.mrb[14].mxu0 %vm296_vm0, %v2542_v36 }
 0x1b9   : > { %2242 = vmatpush3.bf16.msra.mxu1 %v2520_v32  ;;  %2245 = vmatpush3.bf16.msra.mxu0 %v2516_v28 }
 0x1ba   : > { %2246 = vmatprep.subr.bf16.mxu0 %v2388_v31  ;;  %2249 = vmatprep.subr.bf16.mxu1 %v2388_v31 }
 0x1bb   : > { %2129 = vmatprep.mubr.msk.f32.mxu0 %vm2389_vm1, %v2387_v7 }
 0x1bc   : > { %2119 = vmatmul.mubr.msk.f32.vlgmr.msra.gmra.mrb[14].mxu1 %vm296_vm0, %v1469_v46 }
 0x1bd   : > { %2248 = vmatpush3.bf16.msra.mxu0 %v2520_v32  ;;  %2251 = vmatpush3.bf16.msra.mxu1 %v2516_v28 }
 0x1be   : > { %2252 = vmatprep.subr.bf16.mxu1 %v2388_v31  ;;  %2140 = vmatprep.mubr.msk.f32.mxu1 %vm2389_vm1, %v2387_v7 }
 0x1c0   : > { %2130 = vmatmul.mubr.msk.f32.vlgmr.msra.gmra.mrb[16].mxu0 %vm296_vm0, %v1548_v47 }
 0x1c1   : > { %2254 = vmatpush3.bf16.msra.mxu1 %v2520_v32 }
 0x1c4   : > { %2141 = vmatmul.mubr.msk.f32.vlgmr.msra.gmra.mrb[16].mxu1 %vm296_vm0, %v1627_v48 }
 0x1ed   : > { %v514_v50 = vpop.f32.mrb[2].mxu0 }
 0x1ee   : > { %v515_v51 = vadd.f32 %v514_v50, %v444_v49  ;;  %v1977_v52 = vpop.f32.mrb[3].mxu0 }
 0x1f0   : > { %519 = vst.msk [vmem:[%s2650_s9] sm:$0xff] %vm518_vm2, %v515_v51 }
 0x25f   : > { %v593_v54 = vpop.f32.mrb[2].mxu1 }
 0x260   : > { %v594_v55 = vadd.f32 %v593_v54, %v522_v53  ;;  %v1988_v56 = vpop.f32.mrb[3].mxu1 }
 0x262   : > { %1840 = vst.msk [vmem:[%s2650_s9 + $0x8] sm:$0xff] %vm518_vm2, %v594_v55 }
 0x263   : > { %v672_v58 = vpop.f32.mrb[4].mxu0 }
 0x264   : > { %v673_v59 = vadd.f32 %v672_v58, %v601_v57  ;;  %v1999_v60 = vpop.f32.mrb[5].mxu0 }
 0x266   : > { %1843 = vst.msk [vmem:[%s2650_s9 + $0x10] sm:$0xff] %vm518_vm2, %v673_v59 }
 0x267   : > { %v751_v62 = vpop.f32.mrb[4].mxu1 }
 0x268   : > { %v752_v63 = vadd.f32 %v751_v62, %v680_v61  ;;  %v2010_v0 = vpop.f32.mrb[5].mxu1 }
 0x26a   : > { %1846 = vst.msk [vmem:[%s2650_s9 + $0x18] sm:$0xff] %vm518_vm2, %v752_v63 }
 0x26b   : > { %v829_v2 = vpop.f32.mrb[6].mxu0 }
 0x26c   : > { %v830_v3 = vadd.f32 %v829_v2, %v759_v1  ;;  %v2021_v4 = vpop.f32.mrb[7].mxu0 }
 0x26e   : > { %1849 = vst.msk [vmem:[%s2650_s9 + $0x20] sm:$0xff] %vm518_vm2, %v830_v3 }
 0x26f   : > { %v908_v6 = vpop.f32.mrb[6].mxu1 }
 0x270   : > { %v909_v7 = vadd.f32 %v908_v6, %v837_v5  ;;  %v2032_v8 = vpop.f32.mrb[7].mxu1 }
 0x272   : > { %1852 = vst.msk [vmem:[%s2650_s9 + $0x28] sm:$0xff] %vm518_vm2, %v909_v7 }
 0x273   : > { %v987_v10 = vpop.f32.mrb[8].mxu0 }
 0x274   : > { %v988_v11 = vadd.f32 %v987_v10, %v916_v9  ;;  %v2043_v12 = vpop.f32.mrb[9].mxu0 }
 0x276   : > { %1855 = vst.msk [vmem:[%s2650_s9 + $0x30] sm:$0xff] %vm518_vm2, %v988_v11 }
 0x277   : > { %v1066_v14 = vpop.f32.mrb[8].mxu1 }
 0x278   : > { %v1067_v15 = vadd.f32 %v1066_v14, %v995_v13  ;;  %v2054_v16 = vpop.f32.mrb[9].mxu1 }
 0x27a   : > { %1858 = vst.msk [vmem:[%s2650_s9 + $0x38] sm:$0xff] %vm518_vm2, %v1067_v15 }
 0x27b   : > { %v1144_v18 = vpop.f32.mrb[10].mxu0 }
 0x27c   : > { %v1145_v19 = vadd.f32 %v1144_v18, %v1074_v17  ;;  %v2065_v20 = vpop.f32.mrb[11].mxu0 }
 0x27e   : > { %1861 = vst.msk [vmem:[%s2650_s9 + $0x40] sm:$0xff] %vm518_vm2, %v1145_v19 }
 0x27f   : > { %v1223_v22 = vpop.f32.mrb[10].mxu1 }
 0x280   : > { %v1224_v23 = vadd.f32 %v1223_v22, %v1152_v21  ;;  %v2076_v24 = vpop.f32.mrb[11].mxu1 }
 0x282   : > { %1864 = vst.msk [vmem:[%s2650_s9 + $0x48] sm:$0xff] %vm518_vm2, %v1224_v23 }
 0x283   : > { %v1302_v26 = vpop.f32.mrb[12].mxu0 }
 0x284   : > { %v1303_v27 = vadd.f32 %v1302_v26, %v1231_v25  ;;  %v2087_v28 = vpop.f32.mrb[13].mxu0 }
 0x286   : > { %1867 = vst.msk [vmem:[%s2650_s9 + $0x50] sm:$0xff] %vm518_vm2, %v1303_v27 }
 0x287   : > { %v1381_v30 = vpop.f32.mrb[12].mxu1 }
 0x288   : > { %v1382_v31 = vadd.f32 %v1381_v30, %v1310_v29  ;;  %v2098_v32 = vpop.f32.mrb[13].mxu1 }
 0x28a   : > { %1870 = vst.msk [vmem:[%s2650_s9 + $0x58] sm:$0xff] %vm518_vm2, %v1382_v31 }
 0x28b   : > { %v1459_v34 = vpop.f32.mrb[14].mxu0 }
 0x28c   : > { %v1460_v35 = vadd.f32 %v1459_v34, %v1389_v33  ;;  %v2109_v36 = vpop.f32.mrb[15].mxu0 }
 0x28e   : > { %1873 = vst.msk [vmem:[%s2650_s9 + $0x60] sm:$0xff] %vm518_vm2, %v1460_v35 }
 0x28f   : > { %v1538_v38 = vpop.f32.mrb[14].mxu1 }
 0x290   : > { %v1539_v39 = vadd.f32 %v1538_v38, %v1467_v37  ;;  %v2120_v40 = vpop.f32.mrb[15].mxu1 }
 0x292   : > { %1876 = vst.msk [vmem:[%s2650_s9 + $0x68] sm:$0xff] %vm518_vm2, %v1539_v39 }
 0x293   : > { %v1617_v42 = vpop.f32.mrb[16].mxu0 }
 0x294   : > { %v1618_v43 = vadd.f32 %v1617_v42, %v1546_v41  ;;  %v2131_v44 = vpop.f32.mrb[17].mxu0 }
 0x296   : > { %1879 = vst.msk [vmem:[%s2650_s9 + $0x70] sm:$0xff] %vm518_vm2, %v1618_v43 }
 0x297   : > { %v1696_v46 = vpop.f32.mrb[16].mxu1 }
 0x298   : > { %v1697_v47 = vadd.f32 %v1696_v46, %v1625_v45  ;;  %v2142_v48 = vpop.f32.mrb[17].mxu1 }
 0x29a   : > { %1882 = vst.msk [vmem:[%s2650_s9 + $0x78] sm:$0xff] %vm518_vm2, %v1697_v47 }
 0x29b PF: > { %s16_s17 = sadd.s32 1, %s2381_s17   ;;  %s2701_s15 = smov %s2377_s16 }
 0x29c   : > { %p13_p3 = scmp.ge.s32.totalorder %s16_s17, 4   ;;  %s2702_s16 = smov %s2704_s19 }
 0x29e   :  { %15 = sbr.rel (!%p13_p3) target bundleno = 3 (0x3), region = 95 }
 0x2a5   :  { %1732 = vsyncpa [#allocation3], 1 }
 0x2a6   :  { %1734 = vsyncpa [#allocation3 + $0x1], 1 }
 0x2a7   :  { %1735 = vsyncpa [#allocation4], 1 }
 0x2a8   :  { %1737 = vsyncpa [#allocation4 + $0x1], 1 }

</bundles_post_ra>
